<compile_context>
chip_gen: v7x
topology: tpu7x:2x2x1
jax: 0.10.0
libtpu: 0.0.40
codegen_flags: <defaults>
</compile_context>

<pallas_src>
import jax
import jax.numpy as jnp
import numpy as np
from jax import lax
from jax.experimental import pallas as pl
from jax.experimental.pallas import tpu as pltpu

EPS = 1e-5
LANE = 128


def _round_up(x, n):
    return (x + n - 1) // n * n


def _choose_row_tile(m, target=256):
    if m >= target:
        tm = target
    else:
        tm = max(8, _round_up(m, 8))
    return tm, _round_up(m, tm)


# ----------------------------------------------------------------------------
# Pallas kernels
# ----------------------------------------------------------------------------
def _conv_stats_kernel(a_ref, b_ref, o_ref, sum_ref, sq_ref):
    """(tm, K) bf16 @ (K, Cpad) bf16 -> f32, fused per-channel sum / sum-sq."""
    @pl.when(pl.program_id(0) == 0)
    def _():
        sum_ref[...] = jnp.zeros_like(sum_ref)
        sq_ref[...] = jnp.zeros_like(sq_ref)

    y = jnp.dot(a_ref[...], b_ref[...], preferred_element_type=jnp.float32)
    o_ref[...] = y
    # XLU reduction on data already in vregs — essentially free under the MXU.
    sum_ref[...] += jnp.sum(y, axis=0, keepdims=True)
    sq_ref[...] += jnp.sum(y * y, axis=0, keepdims=True)


def _bn_relu_kernel(x_ref, s_ref, b_ref, o_ref):
    y = x_ref[...] * s_ref[...] + b_ref[...]
    o_ref[...] = jnp.maximum(y, 0.0).astype(o_ref.dtype)


def _bn_add_relu_kernel(x_ref, idn_ref, s_ref, b_ref, o_ref):
    y = x_ref[...] * s_ref[...] + b_ref[...] + idn_ref[...]
    o_ref[...] = jnp.maximum(y, 0.0).astype(o_ref.dtype)


def _bn_add_bn_relu_kernel(x_ref, cd_ref, s2_ref, b2_ref, sd_ref, bd_ref, o_ref):
    # downsample-path BN affine fused in (identity never hits HBM)
    idn = cd_ref[...] * sd_ref[...] + bd_ref[...]
    y = x_ref[...] * s2_ref[...] + b2_ref[...] + idn
    o_ref[...] = jnp.maximum(y, 0.0).astype(o_ref.dtype)


# ----------------------------------------------------------------------------
# Wrappers around pallas_call
# ----------------------------------------------------------------------------
def _im2col(x_nhwc, k, stride, pad):
    n, h, w, c = x_nhwc.shape
    xp = jnp.pad(x_nhwc, ((0, 0), (pad, pad), (pad, pad), (0, 0))) if pad else x_nhwc
    ho = (h + 2 * pad - k) // stride + 1
    wo = (w + 2 * pad - k) // stride + 1
    cols = []
    for kh in range(k):
        for kw in range(k):
            cols.append(xp[:, kh:kh + ho * stride:stride,
                           kw:kw + wo * stride:stride, :])
    patches = jnp.concatenate(cols, axis=-1).reshape(n * ho * wo, k * k * c)
    return patches, (n, ho, wo)


def conv2d_bn_stats_pallas(x_nhwc, w_oihw, stride, pad, cpad):
    """Conv (im2col + bf16 MXU matmul, f32 accum) fused with BN statistics.

    Returns conv output (m_pad, cpad) f32, per-channel mean/var (length cpad),
    and (n, ho, wo, m_true).
    """
    cout, cin, k, _ = w_oihw.shape
    patches, (n, ho, wo) = _im2col(x_nhwc.astype(jnp.bfloat16), k, stride, pad)
    m, kd = patches.shape
    # (cout, cin, kh, kw) -> (kh, kw, cin, cout) -> (K, cout), then lane-pad.
    w2d = jnp.transpose(w_oihw, (2, 3, 1, 0)).reshape(k * k * cin, cout)
    w2d = jnp.pad(w2d, ((0, 0), (0, cpad - cout))).astype(jnp.bfloat16)

    tm, m_pad = _choose_row_tile(m)
    if m_pad != m:
        # zero rows -> zero conv output -> zero contribution to sum / sum-sq
        patches = jnp.pad(patches, ((0, m_pad - m), (0, 0)))

    out, s, sq = pl.pallas_call(
        _conv_stats_kernel,
        out_shape=(jax.ShapeDtypeStruct((m_pad, cpad), jnp.float32),
                   jax.ShapeDtypeStruct((1, cpad), jnp.float32),
                   jax.ShapeDtypeStruct((1, cpad), jnp.float32)),
        grid=(m_pad // tm,),
        in_specs=[pl.BlockSpec((tm, kd), lambda i: (i, 0)),
                  pl.BlockSpec((kd, cpad), lambda i: (0, 0))],
        out_specs=(pl.BlockSpec((tm, cpad), lambda i: (i, 0)),
                   pl.BlockSpec((1, cpad), lambda i: (0, 0)),
                   pl.BlockSpec((1, cpad), lambda i: (0, 0))),
        # stats accumulate across the row axis -> must stay "arbitrary"
        compiler_params=pltpu.CompilerParams(
            dimension_semantics=("arbitrary",)),
    )(patches, w2d)

    mean = s[0] / m
    # TODO(synk): E[x^2]-mean^2 can cancel for huge M; fine at these scales.
    var = jnp.maximum(sq[0] / m - mean * mean, 0.0)
    return out, mean, var, (n, ho, wo, m)


def bn_relu_pallas(x2d, scale, bias, tm):
    """y = relu(x*scale + bias), stored in bf16 (feeds conv2's im2col)."""
    m_pad, cpad = x2d.shape
    row = pl.BlockSpec((tm, cpad), lambda i: (i, 0))
    vec = pl.BlockSpec((1, cpad), lambda i: (0, 0))
    return pl.pallas_call(
        _bn_relu_kernel,
        out_shape=jax.ShapeDtypeStruct((m_pad, cpad), jnp.bfloat16),
        grid=(m_pad // tm,),
        in_specs=[row, vec, vec],
        out_specs=row,
        compiler_params=pltpu.CompilerParams(dimension_semantics=("parallel",)),
    )(x2d, scale.reshape(1, cpad), bias.reshape(1, cpad))


def bn_residual_relu_pallas(c2, s2, b2, tm, identity=None, cd=None, sd=None, bd=None):
    """out = relu(c2*s2 + b2 + identity_term); identity_term is either a plain
    residual or the downsample path cd*sd + bd computed in-kernel."""
    m_pad, cpad = c2.shape
    row = pl.BlockSpec((tm, cpad), lambda i: (i, 0))
    vec = pl.BlockSpec((1, cpad), lambda i: (0, 0))
    if cd is None:
        kern = _bn_add_relu_kernel
        in_specs = [row, row, vec, vec]
        args = (c2, identity, s2.reshape(1, cpad), b2.reshape(1, cpad))
    else:
        kern = _bn_add_bn_relu_kernel
        in_specs = [row, row, vec, vec, vec, vec]
        args = (c2, cd, s2.reshape(1, cpad), b2.reshape(1, cpad),
                sd.reshape(1, cpad), bd.reshape(1, cpad))
    return pl.pallas_call(
        kern,
        out_shape=jax.ShapeDtypeStruct((m_pad, cpad), jnp.float32),
        grid=(m_pad // tm,),
        in_specs=in_specs,
        out_specs=row,
        compiler_params=pltpu.CompilerParams(dimension_semantics=("parallel",)),
    )(*args)


# ----------------------------------------------------------------------------
# BasicBlock forward
# ----------------------------------------------------------------------------
def basic_block_forward(x_nchw, params, downsample):
    x = jnp.transpose(x_nchw, (0, 2, 3, 1)).astype(jnp.float32)  # -> NHWC
    cout = params["w1"].shape[0]
    cpad = _round_up(cout, LANE)
    stride1 = 2 if downsample else 1

    def scale_bias(gamma, beta, mean, var):
        g = jnp.pad(gamma, (0, cpad - cout))
        bt = jnp.pad(beta, (0, cpad - cout))
        scale = g / jnp.sqrt(var + EPS)
        bias = bt - mean * scale
        return scale, bias

    # conv1 (+ fused bn1 stats) -> bn1-affine + relu (bf16 activation)
    c1, m1, v1, (n, h1, w1, m) = conv2d_bn_stats_pallas(
        x, params["w1"], stride1, 1, cpad)
    tm, m_pad = _choose_row_tile(m)
    s1, b1 = scale_bias(params["g1"], params["b1"], m1, v1)
    a1 = bn_relu_pallas(c1, s1, b1, tm)                     # (m_pad, cpad) bf16
    a1_nhwc = a1[:m, :cout].reshape(n, h1, w1, cout)

    # conv2 (+ fused bn2 stats)
    c2, m2, v2, _ = conv2d_bn_stats_pallas(a1_nhwc, params["w2"], 1, 1, cpad)
    s2, b2 = scale_bias(params["g2"], params["b2"], m2, v2)

    if downsample:
        # downsample conv (+ fused stats); its BN affine is fused into the
        # final residual kernel — no identity tensor materialized in HBM.
        cd, md, vd, _ = conv2d_bn_stats_pallas(x, params["wd"], 2, 0, cpad)
        sd, bd = scale_bias(params["gd"], params["bd"], md, vd)
        out2d = bn_residual_relu_pallas(c2, s2, b2, tm, cd=cd, sd=sd, bd=bd)
    else:
        idn = x.reshape(m, cout)                            # cin == cout here
        idn = jnp.pad(idn, ((0, m_pad - m), (0, cpad - cout)))
        out2d = bn_residual_relu_pallas(c2, s2, b2, tm, identity=idn)

    out = out2d[:m, :cout].reshape(n, h1, w1, cout)
    return jnp.transpose(out, (0, 3, 1, 2))                 # back to NCHW


# ----------------------------------------------------------------------------
# Pure-JAX reference (bf16 MXU inputs, f32 accumulation — same numerics regime)
# ----------------------------------------------------------------------------
def _ref_conv(x_nhwc, w_oihw, stride, pad):
    w = jnp.transpose(w_oihw, (2, 3, 1, 0))
    return lax.conv_general_dilated(
        x_nhwc.astype(jnp.bfloat16), w.astype(jnp.bfloat16),
        (stride, stride), ((pad, pad), (pad, pad)),
        dimension_numbers=("NHWC", "HWIO", "NHWC"),
        preferred_element_type=jnp.float32)


def _ref_bn(x_nhwc, gamma, beta):
    mean = jnp.mean(x_nhwc, axis=(0, 1, 2))
    var = jnp.var(x_nhwc, axis=(0, 1, 2))
    return (x_nhwc - mean) / jnp.sqrt(var + EPS) * gamma + beta


def basic_block_reference(x_nchw, params, downsample):
    x = jnp.transpose(x_nchw, (0, 2, 3, 1)).astype(jnp.float32)
    stride1 = 2 if downsample else 1
    out = _ref_conv(x, params["w1"], stride1, 1)
    out = jnp.maximum(_ref_bn(out, params["g1"], params["b1"]), 0.0)
    out = _ref_conv(out, params["w2"], 1, 1)
    out = _ref_bn(out, params["g2"], params["b2"])
    if downsample:
        idn = _ref_conv(x, params["wd"], 2, 0)
        idn = _ref_bn(idn, params["gd"], params["bd"])
    else:
        idn = x
    out = jnp.maximum(out + idn, 0.0)
    return jnp.transpose(out, (0, 3, 1, 2))


# ----------------------------------------------------------------------------
# Deterministic parameter init
# ----------------------------------------------------------------------------
def make_params(key, cin, cout, downsample):
    ks = jax.random.split(key, 9)
    p = {
        "w1": 0.1 * jax.random.normal(ks[0], (cout, cin, 3, 3), jnp.float32),
        "w2": 0.1 * jax.random.normal(ks[1], (cout, cout, 3, 3), jnp.float32),
        "g1": 1.0 + 0.1 * jax.random.normal(ks[2], (cout,), jnp.float32),
        "b1": 0.1 * jax.random.normal(ks[3], (cout,), jnp.float32),
        "g2": 1.0 + 0.1 * jax.random.normal(ks[4], (cout,), jnp.float32),
        "b2": 0.1 * jax.random.normal(ks[5], (cout,), jnp.float32),
    }
    if downsample:
        p["wd"] = 0.1 * jax.random.normal(ks[6], (cout, cin, 1, 1), jnp.float32)
        p["gd"] = 1.0 + 0.1 * jax.random.normal(ks[7], (cout,), jnp.float32)
        p["bd"] = 0.1 * jax.random.normal(ks[8], (cout,), jnp.float32)
    return p


if __name__ == "__main__":
    key = jax.random.PRNGKey(0)
    kx, kp1, kp2 = jax.random.split(key, 3)

    # Case 1: downsample=True  (in=4, out=8, 16x16 -> 8x8)
    x = jax.random.normal(kx, (2, 4, 16, 16), jnp.float32)
    params_ds = make_params(kp1, 4, 8, downsample=True)
    out_ds = jax.block_until_ready(basic_block_forward(x, params_ds, True))
    ref_ds = basic_block_reference(x, params_ds, True)
    np.testing.assert_allclose(np.asarray(out_ds), np.asarray(ref_ds),
                               rtol=5e-3, atol=5e-3)

    # Case 2: downsample=False (in=out=8, identity skip)
    x2 = jax.random.normal(kx, (2, 8, 16, 16), jnp.float32)
    params_id = make_params(kp2, 8, 8, downsample=False)
    out_id = jax.block_until_ready(basic_block_forward(x2, params_id, False))
    ref_id = basic_block_reference(x2, params_id, False)
    np.testing.assert_allclose(np.asarray(out_id), np.asarray(ref_id),
                               rtol=5e-3, atol=5e-3)

    print("KERNEL_OK")
</pallas_src>

<mosaic_0001>
module attributes {stable_mosaic.version = 11 : i64} {
  func.func @_conv_stats_kernel(%arg0: i32, %arg1: memref<128x36xbf16, #tpu.memory_space<vmem>>, %arg2: memref<36x128xbf16, #tpu.memory_space<vmem>>, %arg3: memref<128x128xf32, #tpu.memory_space<vmem>>, %arg4: memref<1x128xf32, #tpu.memory_space<vmem>>, %arg5: memref<1x128xf32, #tpu.memory_space<vmem>>) attributes {dimension_semantics = [#tpu.dimension_semantics<arbitrary>], iteration_bounds = array<i64: 1>, scalar_prefetch = 0 : i64, scratch_operands = 0 : i64, tpu.core_type = #tpu.core_type<tc>, window_params = [{transform_indices = @transform_0, window_bounds = array<i64: 128, 36>}, {pipeline_mode = #tpu.pipeline_mode<synchronous>, transform_indices = @transform_1, window_bounds = array<i64: 36, 128>}, {transform_indices = @transform_2, window_bounds = array<i64: 128, 128>}, {pipeline_mode = #tpu.pipeline_mode<synchronous>, transform_indices = @transform_3, window_bounds = array<i64: 1, 128>}, {pipeline_mode = #tpu.pipeline_mode<synchronous>, transform_indices = @transform_4, window_bounds = array<i64: 1, 128>}]} {
    %c0_i32 = arith.constant 0 : i32
    %0 = arith.cmpi eq, %arg0, %c0_i32 : i32
    %1 = arith.extui %0 : i1 to i32
    %c0_i32_0 = arith.constant 0 : i32
    %2 = arith.cmpi ne, %1, %c0_i32_0 : i32
    scf.if %2 {
      %cst_16 = arith.constant 0.000000e+00 : f32
      %18 = vector.broadcast %cst_16 : f32 to vector<1x128xf32>
      %c0_17 = arith.constant 0 : index
      %c0_18 = arith.constant 0 : index
      %19 = vector.load %arg4[%c0_17, %c0_18] : memref<1x128xf32, #tpu.memory_space<vmem>>, vector<1x128xf32>
      tpu.vector_store %arg4[%c0_17, %c0_18], %18 {strides = array<i32>} : memref<1x128xf32, #tpu.memory_space<vmem>>, vector<1x128xf32>,
      %cst_19 = arith.constant 0.000000e+00 : f32
      %20 = vector.broadcast %cst_19 : f32 to vector<1x128xf32>
      %c0_20 = arith.constant 0 : index
      %c0_21 = arith.constant 0 : index
      %21 = vector.load %arg5[%c0_20, %c0_21] : memref<1x128xf32, #tpu.memory_space<vmem>>, vector<1x128xf32>
      tpu.vector_store %arg5[%c0_20, %c0_21], %20 {strides = array<i32>} : memref<1x128xf32, #tpu.memory_space<vmem>>, vector<1x128xf32>,
    } else {
    }
    %c0 = arith.constant 0 : index
    %c0_1 = arith.constant 0 : index
    %3 = vector.load %arg1[%c0, %c0_1] : memref<128x36xbf16, #tpu.memory_space<vmem>>, vector<128x36xbf16>
    %c0_2 = arith.constant 0 : index
    %c0_3 = arith.constant 0 : index
    %4 = vector.load %arg2[%c0_2, %c0_3] : memref<36x128xbf16, #tpu.memory_space<vmem>>, vector<36x128xbf16>
    %cst = arith.constant dense<0.000000e+00> : vector<128x128xf32>
    %5 = tpu.matmul %3, %4, %cst {dimension_numbers = #tpu.dot_dimension_numbers<[1], [0], [0], [1], [0, 0, 1, 1], [], []>} : vector<128x36xbf16>, vector<36x128xbf16>, vector<128x128xf32> -> vector<128x128xf32>
    %c0_4 = arith.constant 0 : index
    %c0_5 = arith.constant 0 : index
    %6 = vector.load %arg3[%c0_4, %c0_5] : memref<128x128xf32, #tpu.memory_space<vmem>>, vector<128x128xf32>
    tpu.vector_store %arg3[%c0_4, %c0_5], %5 {strides = array<i32>} : memref<128x128xf32, #tpu.memory_space<vmem>>, vector<128x128xf32>,
    %c0_6 = arith.constant 0 : index
    %c0_7 = arith.constant 0 : index
    %7 = vector.load %arg4[%c0_6, %c0_7] : memref<1x128xf32, #tpu.memory_space<vmem>>, vector<1x128xf32>
    %cst_8 = arith.constant dense<0.000000e+00> : vector<128xf32>
    %8 = vector.multi_reduction <add>, %5, %cst_8 [0] : vector<128x128xf32> to vector<128xf32>
    %9 = vector.shape_cast %8 : vector<128xf32> to vector<1x128xf32>
    %10 = arith.addf %7, %9 : vector<1x128xf32>
    %c0_9 = arith.constant 0 : index
    %c0_10 = arith.constant 0 : index
    %11 = vector.load %arg4[%c0_9, %c0_10] : memref<1x128xf32, #tpu.memory_space<vmem>>, vector<1x128xf32>
    tpu.vector_store %arg4[%c0_9, %c0_10], %10 {strides = array<i32>} : memref<1x128xf32, #tpu.memory_space<vmem>>, vector<1x128xf32>,
    %c0_11 = arith.constant 0 : index
    %c0_12 = arith.constant 0 : index
    %12 = vector.load %arg5[%c0_11, %c0_12] : memref<1x128xf32, #tpu.memory_space<vmem>>, vector<1x128xf32>
    %13 = arith.mulf %5, %5 : vector<128x128xf32>
    %cst_13 = arith.constant dense<0.000000e+00> : vector<128xf32>
    %14 = vector.multi_reduction <add>, %13, %cst_13 [0] : vector<128x128xf32> to vector<128xf32>
    %15 = vector.shape_cast %14 : vector<128xf32> to vector<1x128xf32>
    %16 = arith.addf %12, %15 : vector<1x128xf32>
    %c0_14 = arith.constant 0 : index
    %c0_15 = arith.constant 0 : index
    %17 = vector.load %arg5[%c0_14, %c0_15] : memref<1x128xf32, #tpu.memory_space<vmem>>, vector<1x128xf32>
    tpu.vector_store %arg5[%c0_14, %c0_15], %16 {strides = array<i32>} : memref<1x128xf32, #tpu.memory_space<vmem>>, vector<1x128xf32>,
    return
  }
  func.func @transform_0(%arg0: i32) -> (i32, i32) {
    %c0_i32 = arith.constant 0 : i32
    %c0_i32_0 = arith.constant 0 : i32
    return %arg0, %c0_i32 : i32, i32
  }
  func.func @transform_1(%arg0: i32) -> (i32, i32) {
    %c0_i32 = arith.constant 0 : i32
    %c0_i32_0 = arith.constant 0 : i32
    %c0_i32_1 = arith.constant 0 : i32
    return %c0_i32, %c0_i32_0 : i32, i32
  }
  func.func @transform_2(%arg0: i32) -> (i32, i32) {
    %c0_i32 = arith.constant 0 : i32
    %c0_i32_0 = arith.constant 0 : i32
    return %arg0, %c0_i32 : i32, i32
  }
  func.func @transform_3(%arg0: i32) -> (i32, i32) {
    %c0_i32 = arith.constant 0 : i32
    %c0_i32_0 = arith.constant 0 : i32
    %c0_i32_1 = arith.constant 0 : i32
    return %c0_i32, %c0_i32_0 : i32, i32
  }
  func.func @transform_4(%arg0: i32) -> (i32, i32) {
    %c0_i32 = arith.constant 0 : i32
    %c0_i32_0 = arith.constant 0 : i32
    %c0_i32_1 = arith.constant 0 : i32
    return %c0_i32, %c0_i32_0 : i32, i32
  }
}

</mosaic_0001>

<bundles_post_ra>
// kernel: tpu_custom_call.1
= control target key start
LH: loop header
LB: loop body
LE: loop exit
PB: predicated region body
PF: predicated region fallthrough
CT: control target
= control target key end

     0   :  { %10 = vsyncpa [#allocation3], 0  ;;  %vm99_vm0 = vcmask 293888   ;;  %vm124_vm1 = vcmask 1041408   ;;  %s636_s0 = inlined_call_operand.vmem [shape: bf16[128,36], index: 0, kind: input, shape index: {}]   ;;  %s637_s1 = inlined_call_operand.vmem [shape: bf16[36,128], index: 1, kind: input, shape index: {}]   ;;  %s638_s2 = inlined_call_operand.hbm [shape: f32[128,128], index: 2, kind: output, shape index: {0}]   ;;  %s639_s3 = inlined_call_operand.hbm [shape: f32[1,128], index: 3, kind: output, shape index: {1}]   ;;  %s640_s4 = inlined_call_operand.hbm [shape: f32[1,128], index: 4, kind: output, shape index: {2}]  }
   0x1   :  { %v414_v0 = vld [vmem:[%s637_s1] sm:$0xff]   ;;  %v415_v1 = vld [vmem:[%s637_s1 + $0x8] sm:$0xff]   ;;  %v416_v2 = vld [vmem:[%s637_s1 + $0x10] ss:$0 sps:$4 sm:$0x33]  }
   0x2   :  { %378 = vmatprep.subr.bf16.mxu0 %v414_v0  ;;  %v417_v3 = vld [vmem:[%s636_s0] sm:$0xff]   ;;  %400 = vmatprep.subr.bf16.mxu1 %v414_v0  ;;  %v126_v5 = vsel %vm124_vm1, %v416_v2, 0  ;;  %v418_v6 = vld [vmem:[%s636_s0 + $0x8] sm:$0xff]  }
   0x3   :  { %379 = vmatpush3.bf16.msra.mxu0 %v414_v0  ;;  %403 = vmatpush3.bf16.msra.mxu1 %v414_v0  ;;  %v421_v4 = vld [vmem:[%s636_s0 + $0x20] sm:$0xff]   ;;  %v422_v7 = vld [vmem:[%s636_s0 + $0x28] sm:$0xff]  }
   0x4   :  { %380 = vmatprep.subr.bf16.mxu0 %v415_v1  ;;  %384 = vmatprep.mubr.msk.bf16.mxu0 %vm99_vm0, %v417_v3 }
   0x5   :  { %401 = vmatprep.subr.bf16.mxu1 %v415_v1  ;;  %392 = vmatprep.mubr.msk.bf16.mxu1 %vm99_vm0, %v421_v4 }
   0x7   :  { %381 = vmatpush3.bf16.msra.mxu0 %v415_v1  ;;  %404 = vmatpush3.bf16.msra.mxu1 %v415_v1 }
   0x8   :  { %406 = vmatprep.subr.msk.bf16.mxu0 %vm124_vm1, %v416_v2  ;;  %407 = vmatprep.subr.msk.bf16.mxu1 %vm124_vm1, %v416_v2 }
   0x9   :  { %11 = vsyncpa [#allocation5], 0  ;;  %v419_v8 = vld [vmem:[%s636_s0 + $0x10] sm:$0xff]   ;;  %v420_v10 = vld [vmem:[%s636_s0 + $0x18] sm:$0xff]   ;;  %v495_v12 = vmov 0.0  }
   0xa   :  { %v423_v9 = vld [vmem:[%s636_s0 + $0x30] sm:$0xff]   ;;  %v424_v11 = vld [vmem:[%s636_s0 + $0x38] sm:$0xff]   ;;  %21 = vst [vmem:[#allocation4] sm:$0x1] %v495_v12  ;;  %22 = vst [vmem:[#allocation6] sm:$0x1] %v495_v12 }
   0xb   :  { %383 = vmatpush3.bf16.msra.mxu0 %v126_v5  ;;  %405 = vmatpush3.bf16.msra.mxu1 %v126_v5  ;;  %s496_s0 = smov [#allocation2]  }
   0xc   :  { %s310_s10 = sshll.u32 %s496_s0, 4  ;;  %s576_s10 = int_to_ptr.vmem [resolvable:$true] %s310_s10 }
   0xd   :  { %s425_s11 = scalar_lea.vmem %s576_s10, 2048  ;;  %p430_p1 = scmp.lt.s32.totalorder %s576_s10, %s576_s10 }
   0xe   :  { %385 = vmatmul.mubr.msk.bf16.vlgmr.msra.gmra.mrb[0].mxu0 %vm99_vm0, %v418_v6  ;;  %393 = vmatmul.mubr.msk.bf16.vlgmr.msra.gmra.mrb[0].mxu1 %vm99_vm0, %v422_v7  ;;  %p426_p0 = scmp.ne.s32.totalorder %s576_s10, %s425_s11  ;;  %p431_p2 = scmp.lt.s32.totalorder %s425_s11, %s425_s11 }
   0xf   :  { %388 = vmatprep.mubr.msk.bf16.mxu0 %vm99_vm0, %v419_v8  ;;  %396 = vmatprep.mubr.msk.bf16.mxu1 %vm99_vm0, %v423_v9 }
  0x10   :  { %p432_p3 = por %p431_p2, %p430_p1 }
  0x12   :  { %p433_p4 = pnand %p432_p3, %p426_p0 }
  0x16   :  { %389 = vmatmul.mubr.msk.bf16.gmra.mrb[4].mxu0 %vm99_vm0, %v420_v10  ;;  %397 = vmatmul.mubr.msk.bf16.gmra.mrb[4].mxu1 %vm99_vm0, %v424_v11 }
  0xe1   :  { %v386_v13 = vpop.f32.mrb[0].mxu0  ;;  %v567_v14 = vpop.f32.mrb[0].mxu1 }
  0xe2   :  { %227 = vst [vmem:[#allocation2 + $0x10] sm:$0xff] %v386_v13  ;;  %v162_v15 = vpop.f32.mrb[1].mxu0  ;;  %235 = vst [vmem:[#allocation2 + $0x50] sm:$0xff] %v567_v14  ;;  %v570_v16 = vpop.f32.mrb[1].mxu1  ;;  %v268_v24 = vmul.f32 %v386_v13, %v386_v13 }
  0xe3   :  { %225 = vst [vmem:[#allocation2] sm:$0xff] %v162_v15  ;;  %v387_v17 = vpop.f32.mrb[2].mxu0  ;;  %233 = vst [vmem:[#allocation2 + $0x40] sm:$0xff] %v570_v16  ;;  %v573_v18 = vpop.f32.mrb[2].mxu1  ;;  %v266_v21 = vmul.f32 %v162_v15, %v162_v15 }
  0xe4   :  { %228 = vst [vmem:[#allocation2 + $0x18] sm:$0xff] %v387_v17  ;;  %v165_v19 = vpop.f32.mrb[3].mxu0  ;;  %236 = vst [vmem:[#allocation2 + $0x58] sm:$0xff] %v573_v18  ;;  %v197_v20 = vpop.f32.mrb[3].mxu1  ;;  %v269_v27 = vmul.f32 %v387_v17, %v387_v17 }
  0xe5   :  { %226 = vst [vmem:[#allocation2 + $0x8] sm:$0xff] %v165_v19  ;;  %v242_v22 = vadd.f32 %v165_v19, %v162_v15  ;;  %v267_v23 = vmul.f32 %v165_v19, %v165_v19  ;;  %234 = vst [vmem:[#allocation2 + $0x48] sm:$0xff] %v197_v20 }
  0xe7   :  { %v243_v25 = vadd.f32 %v386_v13, %v242_v22  ;;  %v282_v26 = vadd.f32 %v267_v23, %v266_v21 }
  0xe9   :  { %v283_v28 = vadd.f32 %v282_v26, %v268_v24  ;;  %v390_v29 = vpop.f32.mrb[4].mxu0  ;;  %v244_v30 = vadd.f32 %v387_v17, %v243_v25  ;;  %v398_v31 = vpop.f32.mrb[4].mxu1 }
  0xea   :  { %231 = vst [vmem:[#allocation2 + $0x30] sm:$0xff] %v390_v29  ;;  %v178_v32 = vpop.f32.mrb[5].mxu0  ;;  %239 = vst [vmem:[#allocation2 + $0x70] sm:$0xff] %v398_v31  ;;  %v210_v33 = vpop.f32.mrb[5].mxu1 }
  0xeb   :  { %229 = vst [vmem:[#allocation2 + $0x20] sm:$0xff] %v178_v32  ;;  %v245_v34 = vadd.f32 %v244_v30, %v178_v32  ;;  %v270_v35 = vmul.f32 %v178_v32, %v178_v32  ;;  %v284_v36 = vadd.f32 %v283_v28, %v269_v27  ;;  %v391_v37 = vpop.f32.mrb[6].mxu0  ;;  %237 = vst [vmem:[#allocation2 + $0x60] sm:$0xff] %v210_v33  ;;  %v399_v38 = vpop.f32.mrb[6].mxu1 }
  0xec   :  { %232 = vst [vmem:[#allocation2 + $0x38] sm:$0xff] %v391_v37  ;;  %v181_v39 = vpop.f32.mrb[7].mxu0  ;;  %240 = vst [vmem:[#allocation2 + $0x78] sm:$0xff] %v399_v38  ;;  %v213_v40 = vpop.f32.mrb[7].mxu1 }
  0xed   :  { %v285_v41 = vadd.f32 %v284_v36, %v270_v35  ;;  %230 = vst [vmem:[#allocation2 + $0x28] sm:$0xff] %v181_v39  ;;  %v246_v42 = vadd.f32 %v245_v34, %v181_v39  ;;  %v271_v43 = vmul.f32 %v181_v39, %v181_v39  ;;  %238 = vst [vmem:[#allocation2 + $0x68] sm:$0xff] %v213_v40 }
  0xee   :  { %436 = shalt.err (!%p433_p4)
}
  0xef   :  { %s437_s14 = scalar_lea.hbm %s638_s2, 2048 }
  0xf0   :  { %p438_p5 = scmp.ne.s32.totalorder %s638_s2, %s437_s14  ;;  %p441_p6 = scmp.lt.u32.totalorder %s437_s14, %s638_s2 }
  0xf2   :  { %p443_p7 = pnand %p441_p6, %p438_p5 }
  0xf4   :  { %446 = shalt.err (!%p443_p7)
}
  0xf5   :  { %s497_s19 = smov 128   ;;  %s498_s20 = smov 8   ;;  %v272_v44 = vmul.f32 %v390_v29, %v390_v29  ;;  %v247_v45 = vadd.f32 %v390_v29, %v246_v42  ;;  %v286_v46 = vadd.f32 %v285_v41, %v271_v43  ;;  %v273_v47 = vmul.f32 %v391_v37, %v391_v37  ;;  %v265_v23 = vld [vmem:[#allocation6] sm:$0x1] }
  0xf6   :  { %316 = dma.vmem_to_hbm [thread:$0]  %s576_s10, 2048, %s638_s2, [#allocation3], %s497_s19, %s497_s19, %s498_s20   ;;  %v274_v50 = vmul.f32 %v570_v16, %v570_v16  ;;  %v275_v55 = vmul.f32 %v197_v20, %v197_v20  ;;  %v276_v56 = vmul.f32 %v567_v14, %v567_v14  ;;  %v277_v59 = vmul.f32 %v573_v18, %v573_v18 }
  0xf7   :  { %v287_v48 = vadd.f32 %v286_v46, %v272_v44  ;;  %v248_v49 = vadd.f32 %v391_v37, %v247_v45  ;;  %v278_v62 = vmul.f32 %v210_v33, %v210_v33  ;;  %v279_v3 = vmul.f32 %v213_v40, %v213_v40  ;;  %s499_s2 = smov [#allocation4]   ;;  %s500_s24 = smov [#allocation6]  }
  0xf8   :  { %v280_v4 = vmul.f32 %v398_v31, %v398_v31  ;;  %v281_v7 = vmul.f32 %v399_v38, %v399_v38  ;;  %s323_s23 = sshll.u32 %s499_s2, 4  ;;  %s333_s1 = sshll.u32 %s500_s24, 4  ;;  %s324_s23 = int_to_ptr.vmem [resolvable:$true] %s323_s23  ;;  %s604_s1 = int_to_ptr.vmem [resolvable:$true] %s333_s1 }
  0xf9   :  { %v249_v51 = vadd.f32 %v248_v49, %v570_v16  ;;  %v288_v52 = vadd.f32 %v287_v48, %v273_v47  ;;  %s447_s25 = scalar_lea.vmem %s324_s23, 16  ;;  %s451_s26 = scalar_lea.vmem %s324_s23, 32 }
  0xfa   :  { %p448_p8 = scmp.ne.s32.totalorder %s324_s23, %s447_s25  ;;  %p452_p9 = scmp.lt.s32.totalorder %s324_s23, %s324_s23 }
  0xfb   :  { %v289_v53 = vadd.f32 %v288_v52, %v274_v50  ;;  %v250_v54 = vadd.f32 %v249_v51, %v197_v20  ;;  %v241_v20 = vld [vmem:[#allocation4] sm:$0x1]  ;;  %p453_p10 = scmp.lt.s32.totalorder %s451_s26, %s447_s25 }
  0xfd   :  { %v251_v57 = vadd.f32 %v567_v14, %v250_v54  ;;  %v290_v58 = vadd.f32 %v289_v53, %v275_v55  ;;  %p454_p11 = por %p453_p10, %p452_p9 }
  0xff   :  { %v291_v60 = vadd.f32 %v290_v58, %v276_v56  ;;  %v252_v61 = vadd.f32 %v573_v18, %v251_v57  ;;  %p455_p12 = pnand %p454_p11, %p448_p8 }
 0x101   :  { %v253_v63 = vadd.f32 %v252_v61, %v210_v33  ;;  %v292_v0 = vadd.f32 %v291_v60, %v277_v59 }
 0x103   :  { %v293_v1 = vadd.f32 %v292_v0, %v278_v62  ;;  %v254_v2 = vadd.f32 %v253_v63, %v213_v40 }
 0x105   :  { %v255_v5 = vadd.f32 %v398_v31, %v254_v2  ;;  %v294_v6 = vadd.f32 %v293_v1, %v279_v3 }
 0x107   :  { %v256_v8 = vadd.f32 %v399_v38, %v255_v5  ;;  %v295_v9 = vadd.f32 %v294_v6, %v280_v4 }
 0x109   :  { %v257_v10 = vrot.slane %v256_v8, 4  ;;  %v296_v11 = vadd.f32 %v295_v9, %v281_v7 }
 0x10b   :  { %v258_v12 = vadd.f32 %v257_v10, %v256_v8  ;;  %v297_v13 = vrot.slane %v296_v11, 4 }
 0x10d   :  { %v259_v14 = vrot.slane %v258_v12, 2  ;;  %v298_v15 = vadd.f32 %v297_v13, %v296_v11 }
 0x10f   :  { %v260_v16 = vadd.f32 %v259_v14, %v258_v12  ;;  %v299_v17 = vrot.slane %v298_v15, 2 }
 0x111   :  { %v261_v18 = vrot.slane %v260_v16, 1  ;;  %v300_v19 = vadd.f32 %v299_v17, %v298_v15 }
 0x113   :  { %v262_v21 = vadd.f32 %v261_v18, %v260_v16  ;;  %v301_v22 = vrot.slane %v300_v19, 1 }
 0x115   :  { %v263_v24 = vadd.f32 %v262_v21, %v241_v20  ;;  %v302_v25 = vadd.f32 %v301_v22, %v300_v19 }
 0x117   :  { %264 = vst [vmem:[#allocation4] sm:$0x1] %v263_v24  ;;  %v303_v26 = vadd.f32 %v302_v25, %v265_v23 }
 0x118   :  { %458 = shalt.err (!%p455_p12)
}
 0x119   :  { %s459_s29 = scalar_lea.hbm %s639_s3, 16 }
 0x11a   :  { %p460_p13 = scmp.ne.s32.totalorder %s639_s3, %s459_s29  ;;  %p463_p0 = scmp.lt.u32.totalorder %s459_s29, %s639_s3 }
 0x11c   :  { %p465_p1 = pnand %p463_p0, %p460_p13 }
 0x11e   :  { %468 = shalt.err (!%p465_p1)
}
 0x11f   :  { %326 = dma.vmem_to_hbm [thread:$0]  %s324_s23, 16, %s639_s3, [#allocation5]   ;;  %304 = vst [vmem:[#allocation6] sm:$0x1] %v303_v26 }
 0x120   :  { %s469_s0 = scalar_lea.vmem %s604_s1, 16  ;;  %s473_s10 = scalar_lea.vmem %s604_s1, 32 }
 0x121   :  { %p470_p2 = scmp.ne.s32.totalorder %s604_s1, %s469_s0  ;;  %p474_p3 = scmp.lt.s32.totalorder %s604_s1, %s604_s1 }
 0x122   :  { %p475_p4 = scmp.lt.s32.totalorder %s473_s10, %s469_s0 }
 0x124   :  { %p476_p5 = por %p475_p4, %p474_p3 }
 0x126   :  { %p477_p6 = pnand %p476_p5, %p470_p2 }
 0x128   :  { %480 = shalt.err (!%p477_p6)
}
 0x129   :  { %s481_s13 = scalar_lea.hbm %s640_s4, 16 }
 0x12a   :  { %p482_p7 = scmp.ne.s32.totalorder %s640_s4, %s481_s13  ;;  %p485_p8 = scmp.lt.u32.totalorder %s481_s13, %s640_s4 }
 0x12c   :  { %p487_p9 = pnand %p485_p8, %p482_p7 }
 0x12e   :  { %490 = shalt.err (!%p487_p9)
}
 0x12f   :  { %336 = dma.vmem_to_hbm [thread:$0]  %s604_s1, 16, %s640_s4, [#allocation5]  }
 0x130   :  { %491 = dma.done.wait [#allocation3], 2048  }
 0x131   :  { %492 = vsyncadd [#allocation3], 4294965248 }
 0x132   :  { %493 = dma.done.wait [#allocation5], 32  }
 0x133   :  { %494 = vsyncadd [#allocation5], 4294967264 }
 0x134   :  { %346 = vsyncpa [#allocation3], 1 }
 0x135   :  { %347 = vsyncpa [#allocation5], 1 }

</bundles_post_ra>
